<compile_context>
chip_gen: v7x
topology: tpu7x:2x2x1
jax: 0.10.0
libtpu: 0.0.40
codegen_flags: <defaults>
</compile_context>

<pallas_src>
import functools

import jax
import jax.numpy as jnp
from jax.experimental import pallas as pl
from jax.experimental.pallas import tpu as pltpu


def _round_up(x, m):
    return (x + m - 1) // m * m


def _vmem_spec():
    # Small full-array operands -> whole tensor lives in VMEM, no grid needed.
    return pl.BlockSpec(memory_space=pltpu.MemorySpace.VMEM)


# ----------------------------- Fused Pallas kernel ------------------------- #

def fused_decoder_kernel(*refs, num_layers, hidden_size, num_dense):
    """Single-step stacked LSTM + dense head, fully fused.

    ref order:
      inputs : x (B_pad, I),
               state_in (B_pad, 2*L*H)  packed [h_0 | .. | h_{L-1} | c_0 | .. | c_{L-1}],
               (w_ih_t (in_l, 4H), w_hh_t (H, 4H), b (1, 4H)) * num_layers
                   -- i/f/o columns pre-scaled by 0.5 (sigmoid-via-tanh folding),
               (w_d (d_in, d_out), b_d (1, d_out)) * num_dense
      outputs: out   (B_pad, out_pad)      -- lane-dense
               state (B_pad, 2*L*H)        -- same packed layout, aliased with state_in
    """
    n_in = 2 + 3 * num_layers + 2 * num_dense
    in_refs = refs[:n_in]
    out_ref, state_ref = refs[n_in], refs[n_in + 1]

    x_ref, st_in_ref = in_refs[0], in_refs[1]
    lstm_refs = in_refs[2:2 + 3 * num_layers]
    dense_refs = in_refs[2 + 3 * num_layers:]

    H = hidden_size
    L = num_layers
    G = 4 * H

    # Hoisted once (NOT per layer): per-lane post-map constants.
    # Weights carry the 0.5 pre-scale on i/f/o columns, so:
    #   acts = tanh(gates_scaled) * post_mul + post_add
    # gives sigmoid(raw) on i/f/o lanes and tanh(raw) on g lanes -> single EUP pass.
    lane = jax.lax.broadcasted_iota(jnp.int32, (1, G), 1)
    is_g = (lane >= 2 * H) & (lane < 3 * H)
    post_mul = jnp.where(is_g, 1.0, 0.5).astype(jnp.float32)
    post_add = jnp.where(is_g, 0.0, 0.5).astype(jnp.float32)

    layer_in = x_ref[...]
    for l in range(L):
        w_ih = lstm_refs[3 * l][...]        # (in_l, 4H)
        w_hh = lstm_refs[3 * l + 1][...]    # (H, 4H)
        b = lstm_refs[3 * l + 2][...]       # (1, 4H), f32
        h_prev = st_in_ref[:, l * H:(l + 1) * H]                 # (B_pad, H)
        c_prev = st_in_ref[:, (L + l) * H:(L + l + 1) * H]       # (B_pad, H)

        # Split accumulated dots (no lane concat on the critical path).
        gates = (jnp.dot(layer_in.astype(w_ih.dtype), w_ih,
                         preferred_element_type=jnp.float32)
                 + jnp.dot(h_prev.astype(w_hh.dtype), w_hh,
                           preferred_element_type=jnp.float32)
                 + b)

        acts = jnp.tanh(gates) * post_mul + post_add   # one full-width EUP pass

        i = acts[:, 0 * H:1 * H]
        f = acts[:, 1 * H:2 * H]
        g = acts[:, 2 * H:3 * H]
        o = acts[:, 3 * H:4 * H]
        c_new = f * c_prev + i * g
        h_new = o * jnp.tanh(c_new)

        # Write straight into packed lane offsets (no tail concat).
        state_ref[:, l * H:(l + 1) * H] = h_new
        state_ref[:, (L + l) * H:(L + l + 1) * H] = c_new
        layer_in = h_new                    # seq_len == 1: layer output == last hidden

    # Dense head: [Linear + tanh] * (num_dense - 1), then output Linear (lane-padded).
    y = layer_in
    for d in range(num_dense):
        wd = dense_refs[2 * d][...]
        bd = dense_refs[2 * d + 1][...]
        y = jnp.dot(y.astype(wd.dtype), wd, preferred_element_type=jnp.float32) + bd
        if d < num_dense - 1:
            y = jnp.tanh(y)
    out_ref[...] = y


# ------------------------------ Module wrapper ----------------------------- #

class DecoderLSTMRecursivePallas:
    """JAX/Pallas port of DecoderLSTMRecursive.forward (seq_len == 1, act_func = tanh)."""

    def __init__(self, input_size, hidden_size, output_size, num_layers,
                 dense_layers, key, weight_dtype=jnp.float32):
        self.input_size = input_size
        self.hidden_size = hidden_size
        self.output_size = output_size
        self.num_layers = num_layers
        self.out_pad = _round_up(output_size, 128)   # lane-dense final output width

        def uniform(k, shape, bound):
            return jax.random.uniform(k, shape, jnp.float32, -bound, bound)

        n_dense = len(dense_layers) + 1
        self.num_dense = n_dense
        keys = iter(jax.random.split(key, 4 * num_layers + 2 * n_dense))

        H = hidden_size
        kH = 1.0 / float(H) ** 0.5
        # Fold the sigmoid(x)=0.5*(1+tanh(x/2)) pre-scale into the i/f/o gate columns
        # (exact power-of-two scale, construction-time only).
        col_scale = jnp.concatenate([jnp.full((2 * H,), 0.5),
                                     jnp.ones((H,)),
                                     jnp.full((H,), 0.5)]).astype(jnp.float32)

        # LSTM params (PyTorch init: U(-1/sqrt(H), 1/sqrt(H))), pre-transposed.
        self.ref_lstm, self.k_lstm = [], []
        for layer in range(num_layers):
            in_l = input_size if layer == 0 else H
            w_ih = uniform(next(keys), (4 * H, in_l), kH)
            w_hh = uniform(next(keys), (4 * H, H), kH)
            b_ih = uniform(next(keys), (4 * H,), kH)
            b_hh = uniform(next(keys), (4 * H,), kH)
            w_ih_t, w_hh_t = w_ih.T, w_hh.T              # (in_l, 4H), (H, 4H)
            b = (b_ih + b_hh).reshape(1, -1)             # (1, 4H)
            self.ref_lstm.append((w_ih_t, w_hh_t, b))
            self.k_lstm.append(((w_ih_t * col_scale).astype(weight_dtype),
                                (w_hh_t * col_scale).astype(weight_dtype),
                                b * col_scale))          # bias stays f32

        # Dense head: [Linear + tanh] * len(dense_layers), then output Linear
        # (output Linear lane-padded to out_pad with zero columns).
        self.ref_dense, self.k_dense = [], []
        dims = list(dense_layers) + [output_size]
        d_in = H
        for idx, d_out in enumerate(dims):
            kL = 1.0 / float(d_in) ** 0.5
            w_t = uniform(next(keys), (d_out, d_in), kL).T   # (d_in, d_out)
            b = uniform(next(keys), (d_out,), kL).reshape(1, -1)
            self.ref_dense.append((w_t, b))
            wk, bk = w_t, b
            if idx == len(dims) - 1 and self.out_pad != d_out:
                wk = jnp.pad(wk, ((0, 0), (0, self.out_pad - d_out)))
                bk = jnp.pad(bk, ((0, 0), (0, self.out_pad - d_out)))
            self.k_dense.append((wk.astype(weight_dtype), bk))
            d_in = d_out

        self._jit_forward = jax.jit(self._forward_impl)
        # Packed-state step for recursive decode loops: state stays lane-dense and is
        # donated so the pallas_call alias writes it in place.
        self.forward_packed = jax.jit(self._packed_call, donate_argnums=(1,))

    # ---------------- packed-state helpers ---------------- #

    def pad_inputs(self, x):
        batch = x.shape[0]
        b_pad = _round_up(max(batch, 1), 8)
        return jnp.zeros((b_pad, self.input_size), jnp.float32).at[:batch].set(x)

    def pack_state(self, h0, c0):
        L, H = self.num_layers, self.hidden_size
        batch = h0.shape[1]
        b_pad = _round_up(max(batch, 1), 8)
        hc = jnp.concatenate([h0, c0], axis=0)                  # (2L, B, H)
        hc = jnp.transpose(hc, (1, 0, 2)).reshape(batch, 2 * L * H)
        return jnp.zeros((b_pad, 2 * L * H), jnp.float32).at[:batch].set(hc)

    def unpack_state(self, state, batch):
        L, H = self.num_layers, self.hidden_size
        hc = state[:batch].reshape(batch, 2 * L, H)
        hc = jnp.transpose(hc, (1, 0, 2))                       # (2L, batch, H)
        return hc[:L], hc[L:]

    # ---------------- kernel invocation ---------------- #

    def _packed_call(self, x_p, state_p):
        L, H = self.num_layers, self.hidden_size
        b_pad = x_p.shape[0]
        args = [x_p, state_p]
        for w_ih, w_hh, b in self.k_lstm:
            args += [w_ih, w_hh, b]
        for w, b in self.k_dense:
            args += [w, b]

        kernel = functools.partial(fused_decoder_kernel, num_layers=L,
                                   hidden_size=H, num_dense=self.num_dense)
        return pl.pallas_call(
            kernel,
            out_shape=(jax.ShapeDtypeStruct((b_pad, self.out_pad), jnp.float32),
                       jax.ShapeDtypeStruct((b_pad, 2 * L * H), jnp.float32)),
            in_specs=[_vmem_spec()] * len(args),
            out_specs=(_vmem_spec(), _vmem_spec()),
            input_output_aliases={1: 1},   # packed state updated in place
        )(*args)

    def _forward_impl(self, inputs, h0, c0):
        batch = inputs.shape[0]
        x_p = self.pad_inputs(inputs)
        state_p = self.pack_state(h0, c0)
        out_p, state_o = self._packed_call(x_p, state_p)
        output = out_p[:batch, :self.output_size]
        h_n, c_n = self.unpack_state(state_o, batch)
        return output, h_n, c_n

    def forward(self, inputs, encoder_hidden_states):
        """inputs: (batch, input_size); encoder_hidden_states: (h0, c0),
        each (num_layers, batch, hidden_size)."""
        h0, c0 = encoder_hidden_states
        output, h_n, c_n = self._jit_forward(inputs, h0, c0)
        return output, (h_n, c_n)


# ------------------------------ Pure-JAX reference ------------------------- #

def reference_forward(model, x, h0, c0):
    H = model.hidden_size
    layer_in = x
    hs, cs = [], []
    for l, (w_ih_t, w_hh_t, b) in enumerate(model.ref_lstm):
        gates = layer_in @ w_ih_t + h0[l] @ w_hh_t + b
        i = jax.nn.sigmoid(gates[:, :H])
        f = jax.nn.sigmoid(gates[:, H:2 * H])
        g = jnp.tanh(gates[:, 2 * H:3 * H])
        o = jax.nn.sigmoid(gates[:, 3 * H:])
        c_new = f * c0[l] + i * g
        h_new = o * jnp.tanh(c_new)
        hs.append(h_new)
        cs.append(c_new)
        layer_in = h_new
    y = layer_in
    n = len(model.ref_dense)
    for idx, (w, b) in enumerate(model.ref_dense):
        y = y @ w + b
        if idx < n - 1:
            y = jnp.tanh(y)
    return y, jnp.stack(hs, 0), jnp.stack(cs, 0)


# ----------------------------------- Main ----------------------------------- #

if __name__ == "__main__":
    root = jax.random.PRNGKey(0)
    k_params, k_x, k_h, k_c = jax.random.split(root, 4)

    batch = 2
    input_size = 16
    hidden_size = 32
    output_size = 8
    num_layers = 2
    dense_layers = (32, 16)

    model = DecoderLSTMRecursivePallas(input_size, hidden_size, output_size,
                                       num_layers, dense_layers, k_params)

    x = jax.random.normal(k_x, (batch, input_size), jnp.float32)
    h0 = jax.random.normal(k_h, (num_layers, batch, hidden_size), jnp.float32)
    c0 = jax.random.normal(k_c, (num_layers, batch, hidden_size), jnp.float32)

    # Single-step forward (PyTorch-compatible interface).
    output, (h_n, c_n) = model.forward(x, (h0, c0))
    jax.block_until_ready((output, h_n, c_n))

    ref_out, ref_h, ref_c = reference_forward(model, x, h0, c0)
    assert output.shape == (batch, output_size)
    assert h_n.shape == (num_layers, batch, hidden_size)
    assert c_n.shape == (num_layers, batch, hidden_size)
    assert jnp.allclose(output, ref_out, atol=1e-4, rtol=1e-4)
    assert jnp.allclose(h_n, ref_h, atol=1e-4, rtol=1e-4)
    assert jnp.allclose(c_n, ref_c, atol=1e-4, rtol=1e-4)

    # Packed-state recursive decode path: state stays lane-dense / aliased between calls,
    # pack/unpack happen only once outside the loop.
    steps = 3
    state = model.pack_state(h0, c0)
    x_p = model.pad_inputs(x)
    rh, rc = h0, c0
    for _ in range(steps):
        out_p, state = model.forward_packed(x_p, state)
        r_out, rh, rc = reference_forward(model, x, rh, rc)
    jax.block_until_ready((out_p, state))
    h_s, c_s = model.unpack_state(state, batch)
    assert jnp.allclose(out_p[:batch, :output_size], r_out, atol=1e-4, rtol=1e-4)
    assert jnp.allclose(h_s, rh, atol=1e-4, rtol=1e-4)
    assert jnp.allclose(c_s, rc, atol=1e-4, rtol=1e-4)

    print("KERNEL_OK")
</pallas_src>

<mosaic_0001>
module attributes {stable_mosaic.version = 11 : i64} {
  func.func @fused_decoder_kernel(%arg0: memref<8x16xf32, #tpu.memory_space<vmem>>, %arg1: memref<8x128xf32, #tpu.memory_space<vmem>>, %arg2: memref<16x128xf32, #tpu.memory_space<vmem>>, %arg3: memref<32x128xf32, #tpu.memory_space<vmem>>, %arg4: memref<1x128xf32, #tpu.memory_space<vmem>>, %arg5: memref<32x128xf32, #tpu.memory_space<vmem>>, %arg6: memref<32x128xf32, #tpu.memory_space<vmem>>, %arg7: memref<1x128xf32, #tpu.memory_space<vmem>>, %arg8: memref<32x32xf32, #tpu.memory_space<vmem>>, %arg9: memref<1x32xf32, #tpu.memory_space<vmem>>, %arg10: memref<32x16xf32, #tpu.memory_space<vmem>>, %arg11: memref<1x16xf32, #tpu.memory_space<vmem>>, %arg12: memref<16x128xf32, #tpu.memory_space<vmem>>, %arg13: memref<1x128xf32, #tpu.memory_space<vmem>>, %arg14: memref<8x128xf32, #tpu.memory_space<vmem>>, %arg15: memref<8x128xf32, #tpu.memory_space<vmem>>) attributes {dimension_semantics = [], scalar_prefetch = 0 : i64, scratch_operands = 0 : i64, tpu.core_type = #tpu.core_type<tc>} {
    %0 = tpu.iota {dimensions = array<i32: 1>} : vector<1x128xi32>
    %c64_i32 = arith.constant 64 : i32
    %1 = vector.broadcast %c64_i32 : i32 to vector<1x128xi32>
    %2 = arith.cmpi sge, %0, %1 : vector<1x128xi32>
    %c96_i32 = arith.constant 96 : i32
    %3 = vector.broadcast %c96_i32 : i32 to vector<1x128xi32>
    %4 = arith.cmpi slt, %0, %3 : vector<1x128xi32>
    %5 = arith.andi %2, %4 : vector<1x128xi1>
    %cst = arith.constant 1.000000e+00 : f32
    %cst_0 = arith.constant 5.000000e-01 : f32
    %6 = vector.broadcast %cst : f32 to vector<1x128xf32>
    %7 = vector.broadcast %cst_0 : f32 to vector<1x128xf32>
    %8 = arith.select %5, %6, %7 : vector<1x128xi1>, vector<1x128xf32>
    %cst_1 = arith.constant 0.000000e+00 : f32
    %cst_2 = arith.constant 5.000000e-01 : f32
    %9 = vector.broadcast %cst_1 : f32 to vector<1x128xf32>
    %10 = vector.broadcast %cst_2 : f32 to vector<1x128xf32>
    %11 = arith.select %5, %9, %10 : vector<1x128xi1>, vector<1x128xf32>
    %c0 = arith.constant 0 : index
    %c0_3 = arith.constant 0 : index
    %12 = vector.load %arg0[%c0, %c0_3] : memref<8x16xf32, #tpu.memory_space<vmem>>, vector<8x16xf32>
    %c0_4 = arith.constant 0 : index
    %c0_5 = arith.constant 0 : index
    %13 = vector.load %arg2[%c0_4, %c0_5] : memref<16x128xf32, #tpu.memory_space<vmem>>, vector<16x128xf32>
    %c0_6 = arith.constant 0 : index
    %c0_7 = arith.constant 0 : index
    %14 = vector.load %arg3[%c0_6, %c0_7] : memref<32x128xf32, #tpu.memory_space<vmem>>, vector<32x128xf32>
    %c0_8 = arith.constant 0 : index
    %c0_9 = arith.constant 0 : index
    %15 = vector.load %arg4[%c0_8, %c0_9] : memref<1x128xf32, #tpu.memory_space<vmem>>, vector<1x128xf32>
    %c0_10 = arith.constant 0 : index
    %c0_11 = arith.constant 0 : index
    %16 = vector.load %arg1[%c0_10, %c0_11] : memref<8x128xf32, #tpu.memory_space<vmem>>, vector<8x32xf32>
    %c0_12 = arith.constant 0 : index
    %c64 = arith.constant 64 : index
    %17 = vector.load %arg1[%c0_12, %c64] : memref<8x128xf32, #tpu.memory_space<vmem>>, vector<8x32xf32>
    %cst_13 = arith.constant dense<0.000000e+00> : vector<8x128xf32>
    %18 = tpu.matmul %12, %13, %cst_13 {dimension_numbers = #tpu.dot_dimension_numbers<[1], [0], [0], [1], [0, 0, 1, 1], [], []>} : vector<8x16xf32>, vector<16x128xf32>, vector<8x128xf32> -> vector<8x128xf32>
    %cst_14 = arith.constant dense<0.000000e+00> : vector<8x128xf32>
    %19 = tpu.matmul %16, %14, %cst_14 {dimension_numbers = #tpu.dot_dimension_numbers<[1], [0], [0], [1], [0, 0, 1, 1], [], []>} : vector<8x32xf32>, vector<32x128xf32>, vector<8x128xf32> -> vector<8x128xf32>
    %20 = arith.addf %18, %19 : vector<8x128xf32>
    %21 = vector.broadcast %15 : vector<1x128xf32> to vector<8x128xf32>
    %22 = arith.addf %20, %21 : vector<8x128xf32>
    %23 = math.tanh %22 : vector<8x128xf32>
    %24 = vector.broadcast %8 : vector<1x128xf32> to vector<8x128xf32>
    %25 = arith.mulf %23, %24 : vector<8x128xf32>
    %26 = vector.broadcast %11 : vector<1x128xf32> to vector<8x128xf32>
    %27 = arith.addf %25, %26 : vector<8x128xf32>
    %28 = vector.extract_strided_slice %27 {offsets = [0, 0], sizes = [8, 32], strides = [1, 1]} : vector<8x128xf32> to vector<8x32xf32>
    %29 = vector.extract_strided_slice %27 {offsets = [0, 32], sizes = [8, 32], strides = [1, 1]} : vector<8x128xf32> to vector<8x32xf32>
    %30 = vector.extract_strided_slice %27 {offsets = [0, 64], sizes = [8, 32], strides = [1, 1]} : vector<8x128xf32> to vector<8x32xf32>
    %31 = vector.extract_strided_slice %27 {offsets = [0, 96], sizes = [8, 32], strides = [1, 1]} : vector<8x128xf32> to vector<8x32xf32>
    %32 = arith.mulf %29, %17 : vector<8x32xf32>
    %33 = arith.mulf %28, %30 : vector<8x32xf32>
    %34 = arith.addf %32, %33 : vector<8x32xf32>
    %35 = math.tanh %34 : vector<8x32xf32>
    %36 = arith.mulf %31, %35 : vector<8x32xf32>
    %c0_15 = arith.constant 0 : index
    %c0_16 = arith.constant 0 : index
    %37 = vector.load %arg15[%c0_15, %c0_16] : memref<8x128xf32, #tpu.memory_space<vmem>>, vector<8x32xf32>
    tpu.vector_store %arg15[%c0_15, %c0_16], %36 {strides = array<i32>} : memref<8x128xf32, #tpu.memory_space<vmem>>, vector<8x32xf32>,
    %c0_17 = arith.constant 0 : index
    %c64_18 = arith.constant 64 : index
    %38 = vector.load %arg15[%c0_17, %c64_18] : memref<8x128xf32, #tpu.memory_space<vmem>>, vector<8x32xf32>
    tpu.vector_store %arg15[%c0_17, %c64_18], %34 {strides = array<i32>} : memref<8x128xf32, #tpu.memory_space<vmem>>, vector<8x32xf32>,
    %c0_19 = arith.constant 0 : index
    %c0_20 = arith.constant 0 : index
    %39 = vector.load %arg5[%c0_19, %c0_20] : memref<32x128xf32, #tpu.memory_space<vmem>>, vector<32x128xf32>
    %c0_21 = arith.constant 0 : index
    %c0_22 = arith.constant 0 : index
    %40 = vector.load %arg6[%c0_21, %c0_22] : memref<32x128xf32, #tpu.memory_space<vmem>>, vector<32x128xf32>
    %c0_23 = arith.constant 0 : index
    %c0_24 = arith.constant 0 : index
    %41 = vector.load %arg7[%c0_23, %c0_24] : memref<1x128xf32, #tpu.memory_space<vmem>>, vector<1x128xf32>
    %c0_25 = arith.constant 0 : index
    %c32 = arith.constant 32 : index
    %42 = vector.load %arg1[%c0_25, %c32] : memref<8x128xf32, #tpu.memory_space<vmem>>, vector<8x32xf32>
    %c0_26 = arith.constant 0 : index
    %c96 = arith.constant 96 : index
    %43 = vector.load %arg1[%c0_26, %c96] : memref<8x128xf32, #tpu.memory_space<vmem>>, vector<8x32xf32>
    %cst_27 = arith.constant dense<0.000000e+00> : vector<8x128xf32>
    %44 = tpu.matmul %36, %39, %cst_27 {dimension_numbers = #tpu.dot_dimension_numbers<[1], [0], [0], [1], [0, 0, 1, 1], [], []>} : vector<8x32xf32>, vector<32x128xf32>, vector<8x128xf32> -> vector<8x128xf32>
    %cst_28 = arith.constant dense<0.000000e+00> : vector<8x128xf32>
    %45 = tpu.matmul %42, %40, %cst_28 {dimension_numbers = #tpu.dot_dimension_numbers<[1], [0], [0], [1], [0, 0, 1, 1], [], []>} : vector<8x32xf32>, vector<32x128xf32>, vector<8x128xf32> -> vector<8x128xf32>
    %46 = arith.addf %44, %45 : vector<8x128xf32>
    %47 = vector.broadcast %41 : vector<1x128xf32> to vector<8x128xf32>
    %48 = arith.addf %46, %47 : vector<8x128xf32>
    %49 = math.tanh %48 : vector<8x128xf32>
    %50 = vector.broadcast %8 : vector<1x128xf32> to vector<8x128xf32>
    %51 = arith.mulf %49, %50 : vector<8x128xf32>
    %52 = vector.broadcast %11 : vector<1x128xf32> to vector<8x128xf32>
    %53 = arith.addf %51, %52 : vector<8x128xf32>
    %54 = vector.extract_strided_slice %53 {offsets = [0, 0], sizes = [8, 32], strides = [1, 1]} : vector<8x128xf32> to vector<8x32xf32>
    %55 = vector.extract_strided_slice %53 {offsets = [0, 32], sizes = [8, 32], strides = [1, 1]} : vector<8x128xf32> to vector<8x32xf32>
    %56 = vector.extract_strided_slice %53 {offsets = [0, 64], sizes = [8, 32], strides = [1, 1]} : vector<8x128xf32> to vector<8x32xf32>
    %57 = vector.extract_strided_slice %53 {offsets = [0, 96], sizes = [8, 32], strides = [1, 1]} : vector<8x128xf32> to vector<8x32xf32>
    %58 = arith.mulf %55, %43 : vector<8x32xf32>
    %59 = arith.mulf %54, %56 : vector<8x32xf32>
    %60 = arith.addf %58, %59 : vector<8x32xf32>
    %61 = math.tanh %60 : vector<8x32xf32>
    %62 = arith.mulf %57, %61 : vector<8x32xf32>
    %c0_29 = arith.constant 0 : index
    %c32_30 = arith.constant 32 : index
    %63 = vector.load %arg15[%c0_29, %c32_30] : memref<8x128xf32, #tpu.memory_space<vmem>>, vector<8x32xf32>
    tpu.vector_store %arg15[%c0_29, %c32_30], %62 {strides = array<i32>} : memref<8x128xf32, #tpu.memory_space<vmem>>, vector<8x32xf32>,
    %c0_31 = arith.constant 0 : index
    %c96_32 = arith.constant 96 : index
    %64 = vector.load %arg15[%c0_31, %c96_32] : memref<8x128xf32, #tpu.memory_space<vmem>>, vector<8x32xf32>
    tpu.vector_store %arg15[%c0_31, %c96_32], %60 {strides = array<i32>} : memref<8x128xf32, #tpu.memory_space<vmem>>, vector<8x32xf32>,
    %c0_33 = arith.constant 0 : index
    %c0_34 = arith.constant 0 : index
    %65 = vector.load %arg8[%c0_33, %c0_34] : memref<32x32xf32, #tpu.memory_space<vmem>>, vector<32x32xf32>
    %c0_35 = arith.constant 0 : index
    %c0_36 = arith.constant 0 : index
    %66 = vector.load %arg9[%c0_35, %c0_36] : memref<1x32xf32, #tpu.memory_space<vmem>>, vector<1x32xf32>
    %cst_37 = arith.constant dense<0.000000e+00> : vector<8x32xf32>
    %67 = tpu.matmul %62, %65, %cst_37 {dimension_numbers = #tpu.dot_dimension_numbers<[1], [0], [0], [1], [0, 0, 1, 1], [], []>} : vector<8x32xf32>, vector<32x32xf32>, vector<8x32xf32> -> vector<8x32xf32>
    %68 = vector.broadcast %66 : vector<1x32xf32> to vector<8x32xf32>
    %69 = arith.addf %67, %68 : vector<8x32xf32>
    %70 = math.tanh %69 : vector<8x32xf32>
    %c0_38 = arith.constant 0 : index
    %c0_39 = arith.constant 0 : index
    %71 = vector.load %arg10[%c0_38, %c0_39] : memref<32x16xf32, #tpu.memory_space<vmem>>, vector<32x16xf32>
    %c0_40 = arith.constant 0 : index
    %c0_41 = arith.constant 0 : index
    %72 = vector.load %arg11[%c0_40, %c0_41] : memref<1x16xf32, #tpu.memory_space<vmem>>, vector<1x16xf32>
    %cst_42 = arith.constant dense<0.000000e+00> : vector<8x16xf32>
    %73 = tpu.matmul %70, %71, %cst_42 {dimension_numbers = #tpu.dot_dimension_numbers<[1], [0], [0], [1], [0, 0, 1, 1], [], []>} : vector<8x32xf32>, vector<32x16xf32>, vector<8x16xf32> -> vector<8x16xf32>
    %74 = vector.broadcast %72 : vector<1x16xf32> to vector<8x16xf32>
    %75 = arith.addf %73, %74 : vector<8x16xf32>
    %76 = math.tanh %75 : vector<8x16xf32>
    %c0_43 = arith.constant 0 : index
    %c0_44 = arith.constant 0 : index
    %77 = vector.load %arg12[%c0_43, %c0_44] : memref<16x128xf32, #tpu.memory_space<vmem>>, vector<16x128xf32>
    %c0_45 = arith.constant 0 : index
    %c0_46 = arith.constant 0 : index
    %78 = vector.load %arg13[%c0_45, %c0_46] : memref<1x128xf32, #tpu.memory_space<vmem>>, vector<1x128xf32>
    %cst_47 = arith.constant dense<0.000000e+00> : vector<8x128xf32>
    %79 = tpu.matmul %76, %77, %cst_47 {dimension_numbers = #tpu.dot_dimension_numbers<[1], [0], [0], [1], [0, 0, 1, 1], [], []>} : vector<8x16xf32>, vector<16x128xf32>, vector<8x128xf32> -> vector<8x128xf32>
    %80 = vector.broadcast %78 : vector<1x128xf32> to vector<8x128xf32>
    %81 = arith.addf %79, %80 : vector<8x128xf32>
    %c0_48 = arith.constant 0 : index
    %c0_49 = arith.constant 0 : index
    %82 = vector.load %arg14[%c0_48, %c0_49] : memref<8x128xf32, #tpu.memory_space<vmem>>, vector<8x128xf32>
    tpu.vector_store %arg14[%c0_48, %c0_49], %81 {strides = array<i32>} : memref<8x128xf32, #tpu.memory_space<vmem>>, vector<8x128xf32>,
    return
  }
}

</mosaic_0001>

<bundles_post_ra>
// kernel: _forward_impl.1
= control target key start
LH: loop header
LB: loop body
LE: loop exit
PB: predicated region body
PF: predicated region fallthrough
CT: control target
= control target key end

     0   :  { %21 = vsyncpa [#allocation3], 0  ;;  %s1369_s0 = inlined_call_operand.vmem [shape: f32[8,16], index: 0, kind: input, shape index: {}]   ;;  %s1370_s1 = inlined_call_operand.vmem [shape: f32[8,128], index: 1, kind: input, shape index: {}, may-alias: {1,15}]   ;;  %s1371_s2 = inlined_call_operand.hbm [shape: f32[16,128], index: 2, kind: input, shape index: {}]   ;;  %s1372_s3 = inlined_call_operand.hbm [shape: f32[32,128], index: 3, kind: input, shape index: {}]   ;;  %s1373_s4 = inlined_call_operand.hbm [shape: f32[1,128], index: 4, kind: input, shape index: {}]   ;;  %s1374_s5 = inlined_call_operand.hbm [shape: f32[32,128], index: 5, kind: input, shape index: {}]   ;;  %s1375_s6 = inlined_call_operand.hbm [shape: f32[32,128], index: 6, kind: input, shape index: {}]   ;;  %s1376_s7 = inlined_call_operand.vmem [shape: f32[1,128], index: 7, kind: input, shape index: {}]   ;;  %s1377_s8 = inlined_call_operand.vmem [shape: f32[32,32], index: 8, kind: input, shape index: {}]   ;;  %s1378_s9 = inlined_call_operand.vmem [shape: f32[1,32], index: 9, kind: input, shape index: {}]   ;;  %s1379_s10 = inlined_call_operand.vmem [shape: f32[32,16], index: 10, kind: input, shape index: {}]   ;;  %s1380_s11 = inlined_call_operand.vmem [shape: f32[1,16], index: 11, kind: input, shape index: {}]   ;;  %s1381_s12 = inlined_call_operand.vmem [shape: f32[16,128], index: 12, kind: input, shape index: {}]   ;;  %s1382_s13 = inlined_call_operand.vmem [shape: f32[1,128], index: 13, kind: input, shape index: {}]   ;;  %s1383_s14 = inlined_call_operand.vmem [shape: f32[8,128], index: 14, kind: output, shape index: {0}]   ;;  %s1384_s15 = inlined_call_operand.vmem [shape: f32[8,128], index: 15, kind: output, shape index: {1}, may-alias: {1,15}]  }
   0x1   :  { %22 = vsyncpa [#allocation5], 0 }
   0x2   :  { %23 = vsyncpa [#allocation8], 0  ;;  %s1074_s18 = smov [#allocation4]   ;;  %s1075_s20 = smov [#allocation7]  }
   0x3   :  { %s45_s19 = sshll.u32 %s1074_s18, 4  ;;  %s67_s21 = sshll.u32 %s1075_s20, 4  ;;  %s46_s19 = int_to_ptr.vmem [resolvable:$true] %s45_s19  ;;  %s1168_s21 = int_to_ptr.vmem [resolvable:$true] %s67_s21 }
   0x4   :  { %s958_s24 = scalar_lea.hbm %s1372_s3, 512 }
   0x5   :  { %p959_p0 = scmp.ne.s32.totalorder %s1372_s3, %s958_s24  ;;  %p962_p1 = scmp.lt.u32.totalorder %s958_s24, %s1372_s3 }
   0x7   :  { %p964_p2 = pnand %p962_p1, %p959_p0 }
   0x9   :  { %967 = shalt.err (!%p964_p2)
}
   0xa   :  { %s968_s29 = scalar_lea.vmem %s46_s19, 512  ;;  %p973_p4 = scmp.lt.s32.totalorder %s46_s19, %s46_s19 }
   0xb   :  { %p969_p3 = scmp.ne.s32.totalorder %s46_s19, %s968_s29  ;;  %p974_p5 = scmp.lt.s32.totalorder %s968_s29, %s968_s29 }
   0xd   :  { %p975_p6 = por %p974_p5, %p973_p4 }
   0xf   :  { %p976_p7 = pnand %p975_p6, %p969_p3 }
  0x11   :  { %979 = shalt.err (!%p976_p7)
}
  0x12   :  { %s1076_s30 = smov 128   ;;  %s1077_s16 = smov 8  }
  0x13   :  { %51 = dma.hbm_to_vmem [thread:$0]  %s1372_s3, 512, %s46_s19, [#allocation5], %s1076_s30, %s1076_s30, %s1077_s16  }
  0x14   :  { %s980_s23 = scalar_lea.hbm %s1374_s5, 512 }
  0x15   :  { %p981_p8 = scmp.ne.s32.totalorder %s1374_s5, %s980_s23  ;;  %p984_p9 = scmp.lt.u32.totalorder %s980_s23, %s1374_s5 }
  0x17   :  { %p986_p10 = pnand %p984_p9, %p981_p8 }
  0x19   :  { %989 = shalt.err (!%p986_p10)
}
  0x1a   :  { %s990_s28 = scalar_lea.vmem %s1168_s21, 512  ;;  %p995_p12 = scmp.lt.s32.totalorder %s1168_s21, %s1168_s21 }
  0x1b   :  { %p991_p11 = scmp.ne.s32.totalorder %s1168_s21, %s990_s28  ;;  %p996_p13 = scmp.lt.s32.totalorder %s990_s28, %s990_s28 }
  0x1d   :  { %p997_p0 = por %p996_p13, %p995_p12 }
  0x1f   :  { %p998_p1 = pnand %p997_p0, %p991_p11 }
  0x21   :  { %1001 = shalt.err (!%p998_p1)
}
  0x22   :  { %73 = dma.hbm_to_vmem [thread:$0]  %s1374_s5, 512, %s1168_s21, [#allocation8], %s1076_s30, %s1076_s30, %s1077_s16  }
  0x23   :  { %s1078_s29 = smov [#allocation2]   ;;  %s1079_s18 = smov [#allocation6]  }
  0x24   :  { %s33_s17 = sshll.u32 %s1078_s29, 4  ;;  %s58_s20 = sshll.u32 %s1079_s18, 4  ;;  %s34_s17 = int_to_ptr.vmem [resolvable:$true] %s33_s17  ;;  %s59_s20 = int_to_ptr.vmem [resolvable:$true] %s58_s20 }
  0x25   :  { %s1002_s24 = scalar_lea.hbm %s1371_s2, 256 }
  0x26   :  { %p1003_p2 = scmp.ne.s32.totalorder %s1371_s2, %s1002_s24  ;;  %p1006_p3 = scmp.lt.u32.totalorder %s1002_s24, %s1371_s2 }
  0x28   :  { %p1008_p4 = pnand %p1006_p3, %p1003_p2 }
  0x2a   :  { %1011 = shalt.err (!%p1008_p4)
}
  0x2b   :  { %s1012_s5 = scalar_lea.vmem %s34_s17, 256  ;;  %p1017_p6 = scmp.lt.s32.totalorder %s34_s17, %s34_s17 }
  0x2c   :  { %p1013_p5 = scmp.ne.s32.totalorder %s34_s17, %s1012_s5  ;;  %p1018_p7 = scmp.lt.s32.totalorder %s1012_s5, %s1012_s5 }
  0x2e   :  { %p1019_p8 = por %p1018_p7, %p1017_p6 }
  0x30   :  { %p1020_p9 = pnand %p1019_p8, %p1013_p5 }
  0x32   :  { %1023 = shalt.err (!%p1020_p9)
}
  0x33   :  { %39 = dma.hbm_to_vmem [thread:$0]  %s1371_s2, 256, %s34_s17, [#allocation3], %s1076_s30, %s1076_s30, %s1077_s16  }
  0x34   :  { %s1024_s18 = scalar_lea.hbm %s1373_s4, 16 }
  0x35   :  { %p1025_p10 = scmp.ne.s32.totalorder %s1373_s4, %s1024_s18  ;;  %p1028_p11 = scmp.lt.u32.totalorder %s1024_s18, %s1373_s4 }
  0x37   :  { %p1030_p12 = pnand %p1028_p11, %p1025_p10 }
  0x39   :  { %1033 = shalt.err (!%p1030_p12)
}
  0x3a   :  { %s1034_s26 = scalar_lea.vmem %s59_s20, 16  ;;  %s1038_s27 = scalar_lea.vmem %s59_s20, 32 }
  0x3b   :  { %p1035_p13 = scmp.ne.s32.totalorder %s59_s20, %s1034_s26  ;;  %p1039_p0 = scmp.lt.s32.totalorder %s59_s20, %s59_s20 }
  0x3c   :  { %p1040_p1 = scmp.lt.s32.totalorder %s1038_s27, %s1034_s26 }
  0x3e   :  { %p1041_p2 = por %p1040_p1, %p1039_p0 }
  0x40   :  { %p1042_p3 = pnand %p1041_p2, %p1035_p13 }
  0x42   :  { %1045 = shalt.err (!%p1042_p3)
}
  0x43   :  { %61 = dma.hbm_to_vmem [thread:$0]  %s1373_s4, 16, %s59_s20, [#allocation5]  }
  0x44   :  { %s1080_s28 = smov [#allocation9]   ;;  %s1046_s19 = scalar_lea.hbm %s1375_s6, 512 }
  0x45   :  { %s79_s5 = sshll.u32 %s1080_s28, 4  ;;  %p1047_p4 = scmp.ne.s32.totalorder %s1375_s6, %s1046_s19  ;;  %s80_s5 = int_to_ptr.vmem [resolvable:$true] %s79_s5 }
  0x46   :  { %p1050_p5 = scmp.lt.u32.totalorder %s1046_s19, %s1375_s6 }
  0x48   :  { %p1052_p6 = pnand %p1050_p5, %p1047_p4 }
  0x4a   :  { %1055 = shalt.err (!%p1052_p6)
}
  0x4b   :  { %s1056_s24 = scalar_lea.vmem %s80_s5, 512  ;;  %p1061_p8 = scmp.lt.s32.totalorder %s80_s5, %s80_s5 }
  0x4c   :  { %p1057_p7 = scmp.ne.s32.totalorder %s80_s5, %s1056_s24  ;;  %p1062_p9 = scmp.lt.s32.totalorder %s1056_s24, %s1056_s24 }
  0x4e   :  { %p1063_p10 = por %p1062_p9, %p1061_p8 }
  0x50   :  { %p1064_p11 = pnand %p1063_p10, %p1057_p7 }
  0x52   :  { %1067 = shalt.err (!%p1064_p11)
}
  0x53   :  { %85 = dma.hbm_to_vmem [thread:$0]  %s1375_s6, 512, %s80_s5, [#allocation8], %s1076_s30, %s1076_s30, %s1077_s16  }
  0x54   :  { %1068 = dma.done.wait [#allocation3], 256  }
  0x55   :  { %1069 = vsyncadd [#allocation3], 4294967040 }
  0x56   :  { %1070 = dma.done.wait [#allocation5], 528  }
  0x57   :  { %1071 = vsyncadd [#allocation5], 4294966768 }
  0x58   :  { %1072 = dma.done.wait [#allocation8], 1024  }
  0x59   :  { %1073 = vsyncadd [#allocation8], 4294966272  ;;  %v1081_v0 = vmov 0.0|0.0   ;;  %vm1082_vm0 = vmmov 0   ;;  %v1083_v1 = vmov 0.0   ;;  %v125_v2 = vld [vmem:[#allocation4] sm:$0xff]  ;;  %v115_v15 = vlaneseq }
  0x5a   :  { %896 = vmatprep.subr.bf16.mxu0 %v1081_v0  ;;  %902 = vmatprep.subr.bf16.mxu1 %v1081_v0  ;;  %v126_v3 = vld [vmem:[#allocation4 + $0x8] sm:$0xff]  ;;  %v123_v4 = vld [vmem:[#allocation2] sm:$0xff]  ;;  %v124_v6 = vld [vmem:[#allocation2 + $0x8] sm:$0xff]  ;;  %vm205_vm1 = vcmask 130048   ;;  %vm131_vm2 = vcmask 261120   ;;  %v1084_v22 = vmov 0.5  }
  0x5b   :  { %842 = vmatprep.mubr.msk.f32.mxu1 %vm1082_vm0, %v1083_v1  ;;  %835 = vmatprep.mubr.msk.f32.mxu0 %vm1082_vm0, %v1083_v1  ;;  %v897_v5 = vpack.c.bf16 %v126_v3, %v125_v2  ;;  %v127_v7 = vld [vmem:[#allocation4 + $0x10] sm:$0xff]  ;;  %v128_v8 = vld [vmem:[#allocation4 + $0x18] sm:$0xff]  ;;  %v903_v9 = vpack.c.bf16 %v124_v6, %v123_v4  ;;  %v786_v16 = vld [vmem:[#allocation6] ss:$0 sm:$0xff]  ;;  %v116_v21 = vand.u32 127, %v115_v15  ;;  %s1086_s26 = smov 96  }
  0x5c   :  { %v900_v10 = vpack.c.bf16 %v128_v8, %v127_v7  ;;  %v122_v11 = vld [vmem:[%s1369_s0] sm:$0xff]  ;;  %s1085_s0 = smov 64   ;;  %s1087_s27 = smov 32   ;;  %v320_v34 = vld [vmem:[#allocation7] sm:$0xff]  ;;  %v323_v38 = vld [vmem:[#allocation7 + $0x18] sm:$0xff]  ;;  %vm318_vm6 = vcmask 785920  }
  0x5d   :  { %898 = vmatpush3.bf16.msra.mxu0 %v897_v5  ;;  %904 = vmatpush3.bf16.msra.mxu1 %v903_v9  ;;  %v130_v12 = vld [vmem:[%s1370_s1] sm:$0xff]  ;;  %vm117_vm3 = vcmp.ge.s32.totalorder %v116_v21, 64  ;;  %vm118_vm4 = vcmp.lt.s32.totalorder %v116_v21, 96  ;;  %v324_v43 = vld [vmem:[#allocation9] sm:$0xff]  ;;  %v327_v47 = vld [vmem:[#allocation9 + $0x18] sm:$0xff]  ;;  %vm511_vm7 = vcmask 523520  }
  0x5e   :  { %899 = vmatprep.subr.bf16.mxu0 %v1081_v0  ;;  %905 = vmatprep.subr.bf16.mxu1 %v1081_v0  ;;  %vm119_vm5 = vmand %vm117_vm3, %vm118_vm4  ;;  %v321_v35 = vld [vmem:[#allocation7 + $0x8] sm:$0xff]  ;;  %v322_v36 = vld [vmem:[#allocation7 + $0x10] sm:$0xff]  ;;  %vm517_vm8 = vcmask 1048320  }
  0x5f   :  { %v1268_v23 = vsel %vm119_vm5, 1.0, %v1084_v22  ;;  %v1270_v25 = vsel %vm119_vm5, 0.0, %v1084_v22  ;;  %v912_v37 = vpack.c.bf16 %v321_v35, %v320_v34  ;;  %v915_v39 = vpack.c.bf16 %v323_v38, %v322_v36  ;;  %v325_v44 = vld [vmem:[#allocation9 + $0x8] sm:$0xff]  ;;  %v326_v45 = vld [vmem:[#allocation9 + $0x10] sm:$0xff]  ;;  %v521_v9 = vld [vmem:[%s1377_s8 + $0x10] sm:$0xff] }
  0x60   :  { %843 = vmatmul.mubr.msk.f32.vlgmr.msra.gmra.mrb[0].mxu1 %vm205_vm1, %v122_v11  ;;  %v906_v46 = vpack.c.bf16 %v325_v44, %v324_v43  ;;  %v909_v48 = vpack.c.bf16 %v327_v47, %v326_v45  ;;  %v789_v55 = vld [vmem:[%s1376_s7] ss:$0 sm:$0xff]  ;;  %v520_v8 = vld [vmem:[%s1377_s8 + $0x8] sm:$0xff]  ;;  %v522_v11 = vld [vmem:[%s1377_s8 + $0x18] sm:$0xff] }
  0x61   :  { %901 = vmatpush3.bf16.msra.mxu0 %v900_v10  ;;  %853 = vmatprep.mubr.msk.f32.mxu1 %vm1082_vm0, %v1083_v1  ;;  %v519_v7 = vld [vmem:[%s1377_s8] sm:$0xff]  ;;  %v607_v21 = vld [vmem:[%s1379_s10 + $0x10] sm:$0xff] }
  0x62   :  { %911 = vmatprep.subr.bf16.mxu0 %v1081_v0  ;;  %907 = vmatpush3.bf16.msra.mxu1 %v906_v46  ;;  %v918_v10 = vpack.c.bf16 %v520_v8, %v519_v7  ;;  %v794_v36 = vld [vmem:[%s1382_s13] ss:$0 sm:$0xff] }
  0x63   :  { %908 = vmatprep.subr.bf16.mxu1 %v1081_v0 }
  0x64   :  { %836 = vmatmul.mubr.msk.f32.vlgmr.msra.gmra.mrb[0].mxu0 %vm131_vm2, %v130_v12 }
  0x65   :  { %864 = vmatprep.mubr.msk.f32.mxu0 %vm1082_vm0, %v1083_v1  ;;  %913 = vmatpush3.bf16.msra.mxu0 %v912_v37 }
  0x66   :  { %914 = vmatprep.subr.bf16.mxu0 %v1081_v0  ;;  %910 = vmatpush3.bf16.msra.mxu1 %v909_v48 }
  0x67   :  { %917 = vmatprep.subr.bf16.mxu1 %v1081_v0 }
  0x69   :  { %916 = vmatpush3.bf16.msra.mxu0 %v915_v39 }
  0x6a   :  { %923 = vmatprep.subr.bf16.mxu0 %v1081_v0 }
 0x133   :  { %v275_v13 = vpop.f32.mrb[0].mxu1 }
 0x134   :  { %v844_v14 = vpop.f32.mrb[1].mxu1 }
 0x137   :  { %v201_v17 = vpop.f32.mrb[0].mxu0 }
 0x138   :  { %v276_v18 = vadd.f32 %v275_v13, %v201_v17  ;;  %v837_v19 = vpop.f32.mrb[1].mxu0 }
 0x139   :  { %v605_v19 = vld [vmem:[%s1379_s10] sm:$0xff] }
 0x13a   :  { %v285_v20 = vadd.f32 %v786_v16, %v276_v18 }
 0x13c   :  { %946 = vtanh.f32 %v285_v20  ;;  %v606_v20 = vld [vmem:[%s1379_s10 + $0x8] sm:$0xff] }
 0x13d   :  { %v924_v22 = vpack.c.bf16 %v606_v20, %v605_v19 }
 0x146   :  { %v947_v24 = vpop.eup %946 }
 0x147   :  { %v287_v26 = vmul.f32 %v947_v24, %v1268_v23  ;;  %v790_v24 = vld [vmem:[%s1378_s9] ss:$0 sm:$0xff] }
 0x149   :  { %v288_v27 = vadd.f32 %v287_v26, %v1270_v25 }
 0x14b   :  { %294 = vrot.lane.b32.xlu0 %v288_v27, %s1085_s0 }
 0x14f   :  { %289 = vrot.lane.b32.xlu0 %v130_v12, %s1086_s26  ;;  %v921_v12 = vpack.c.bf16 %v522_v11, %v521_v9 }
 0x1bd   :  { %v295_v28 = vpop.permute.xlu0 %294 }
 0x1be   :  { %v297_v29 = vmul.f32 %v295_v28, %v288_v27 }
 0x1c0   :  { %299 = vrot.lane.b32.xlu1 %v297_v29, %s1087_s27  ;;  %v690_v29 = vld [vmem:[%s1381_s12] sm:$0xff] }
 0x1c1   :  { %v290_v30 = vpop.permute.xlu0 %289 }
 0x1c2   :  { %v292_v31 = vmul.f32 %v290_v30, %v288_v27 }
 0x232   :  { %v300_v32 = vpop.permute.xlu1 %299 }
 0x233   :  { %v302_v33 = vadd.f32 %v300_v32, %v292_v31  ;;  %v792_v31 = vld [vmem:[%s1380_s11] ss:$0 sm:$0xff] }
 0x235   :  { %948 = vtanh.f32 %v302_v33 }
 0x23f   :  { %v949_v40 = vpop.eup %948 }
 0x240   :  { %305 = vrot.lane.b32.xlu1 %v949_v40, %s1085_s0 }
 0x244   :  { %315 = vrot.lane.b32.xlu1 %v302_v33, %s1087_s27 }
 0x2b2   :  { %v306_v41 = vpop.permute.xlu1 %305 }
 0x2b3   :  { %v308_v42 = vmul.f32 %v306_v41, %v288_v27 }
 0x2b5   :  { %310 = vrot.lane.b32.xlu0 %v308_v42, %s1087_s27 }
 0x2b6   :  { %v316_v50 = vpop.permute.xlu1 %315 }
 0x327   :  { %v311_v49 = vpop.permute.xlu0 %310 }
 0x328   :  { %313 = vst.msk [vmem:[%s1384_s15] sm:$0xff] %vm131_vm2, %v311_v49  ;;  %865 = vmatmul.mubr.msk.f32.vlgmr.msra.gmra.mrb[2].mxu0 %vm131_vm2, %v311_v49 }
 0x329   :  { %319 = vst.msk [vmem:[%s1384_s15] sm:$0xff] %vm318_vm6, %v316_v50  ;;  %886 = vmatprep.mubr.msk.f32.mxu0 %vm1082_vm0, %v1083_v1  ;;  %925 = vmatpush3.bf16.msra.mxu0 %v924_v22 }
 0x32a   :  { %926 = vmatprep.subr.bf16.mxu0 %v1081_v0 }
 0x330   :  { %v329_v51 = vld [vmem:[%s1370_s1] sm:$0xff] }
 0x331   :  { %331 = vrot.lane.b32.xlu0 %v329_v51, %s1086_s26 }
 0x335   :  { %487 = vrot.lane.b32.xlu0 %v329_v51, %s1085_s0 }
 0x3a3   :  { %v332_v52 = vpop.permute.xlu0 %331 }
 0x3a4   :  { %854 = vmatmul.mubr.msk.f32.vlgmr.msra.gmra.mrb[2].mxu1 %vm131_vm2, %v332_v52 }
 0x3a5   :  { %875 = vmatprep.mubr.msk.f32.mxu1 %vm1082_vm0, %v1083_v1  ;;  %919 = vmatpush3.bf16.msra.mxu1 %v918_v10 }
 0x3a6   :  { %920 = vmatprep.subr.bf16.mxu1 %v1081_v0 }
 0x3a7   :  { %v488_v3 = vpop.permute.xlu0 %487 }
 0x3a9   :  { %922 = vmatpush3.bf16.msra.mxu1 %v921_v12 }
 0x3aa   :  { %929 = vmatprep.subr.bf16.mxu1 %v1081_v0  ;;  %v691_v0 = vld [vmem:[%s1381_s12 + $0x8] sm:$0xff] }
 0x3ab   :  { %v930_v30 = vpack.c.bf16 %v691_v0, %v690_v29 }
 0x3fb   :  { %v473_v53 = vpop.f32.mrb[2].mxu0 }
 0x3fc   :  { %v866_v54 = vpop.f32.mrb[3].mxu0 }
 0x477   :  { %v401_v56 = vpop.f32.mrb[2].mxu1 }
 0x478   :  { %v474_v57 = vadd.f32 %v473_v53, %v401_v56  ;;  %v855_v58 = vpop.f32.mrb[3].mxu1 }
 0x47a   :  { %v483_v59 = vadd.f32 %v789_v55, %v474_v57 }
 0x47c   :  { %950 = vtanh.f32 %v483_v59 }
 0x486   :  { %v951_v60 = vpop.eup %950 }
 0x487   :  { %v485_v61 = vmul.f32 %v951_v60, %v1268_v23 }
 0x489   :  { %v486_v62 = vadd.f32 %v485_v61, %v1270_v25 }
 0x48b   :  { %492 = vrot.lane.b32.xlu1 %v486_v62, %s1085_s0  ;;  %v490_v4 = vmul.f32 %v488_v3, %v486_v62 }
 0x4fd   :  { %v493_v63 = vpop.permute.xlu1 %492 }
 0x4fe   :  { %v495_v2 = vmul.f32 %v493_v63, %v486_v62 }
 0x500   :  { %497 = vrot.lane.b32.xlu1 %v495_v2, %s1087_s27 }
 0x572   :  { %v498_v5 = vpop.permute.xlu1 %497 }
 0x573   :  { %v500_v6 = vadd.f32 %v498_v5, %v490_v4 }
 0x575   :  { %952 = vtanh.f32 %v500_v6 }
 0x57f   :  { %v953_v13 = vpop.eup %952 }
 0x580   :  { %503 = vrot.lane.b32.xlu0 %v953_v13, %s1085_s0 }
 0x5f2   :  { %v504_v14 = vpop.permute.xlu0 %503 }
 0x5f3   :  { %v506_v15 = vmul.f32 %v504_v14, %v486_v62 }
 0x5f5   :  { %508 = vrot.lane.b32.xlu0 %v506_v15, %s1085_s0  ;;  %530 = vrot.lane.b32.xlu1 %v506_v15, %s1087_s27 }
 0x5f9   :  { %514 = vrot.lane.b32.xlu1 %v500_v6, %s1085_s0 }
 0x667   :  { %v509_v16 = vpop.permute.xlu0 %508  ;;  %v531_v17 = vpop.permute.xlu1 %530 }
 0x668   :  { %512 = vst.msk [vmem:[%s1384_s15] sm:$0xff] %vm511_vm7, %v509_v16  ;;  %876 = vmatmul.mubr.msk.f32.vlgmr.msra.gmra.mrb[4].mxu1 %vm131_vm2, %v531_v17 }
 0x669   :  { %893 = vmatprep.mubr.msk.f32.mxu1 %vm1082_vm0, %v1083_v1  ;;  %v608_v1 = vld [vmem:[%s1379_s10 + $0x18] sm:$0xff]  ;;  %931 = vmatpush3.bf16.msra.mxu1 %v930_v30 }
 0x66a   :  { %v927_v23 = vpack.c.bf16 %v608_v1, %v607_v21 }
 0x66b   :  { %v515_v18 = vpop.permute.xlu1 %514 }
 0x66c   :  { %518 = vst.msk [vmem:[%s1384_s15] sm:$0xff] %vm517_vm8, %v515_v18  ;;  %928 = vmatpush3.bf16.msra.mxu0 %v927_v23 }
 0x73b   :  { %v600_v25 = vpop.f32.mrb[4].mxu1 }
 0x73c   :  { %v601_v26 = vadd.f32 %v790_v24, %v600_v25  ;;  %v877_v27 = vpop.f32.mrb[5].mxu1 }
 0x73e   :  { %954 = vtanh.f32 %v601_v26 }
 0x748   :  { %v955_v28 = vpop.eup %954 }
 0x749   :  { %887 = vmatmul.mubr.msk.f32.vlgmr.msra.gmra.mrb[4].mxu0 %vm131_vm2, %v955_v28 }
 0x81c   :  { %v685_v32 = vpop.f32.mrb[4].mxu0 }
 0x81d   :  { %v686_v33 = vadd.f32 %v792_v31, %v685_v32  ;;  %v888_v34 = vpop.f32.mrb[5].mxu0 }
 0x81f   :  { %956 = vtanh.f32 %v686_v33 }
 0x829   :  { %v957_v35 = vpop.eup %956 }
 0x82a   :  { %894 = vmatmul.mubr.msk.f32.vlgmr.msra.gmra.mrb[6].mxu1 %vm205_vm1, %v957_v35 }
 0x8fd   :  { %v768_v37 = vpop.f32.mrb[6].mxu1 }
 0x8fe   :  { %v769_v38 = vadd.f32 %v794_v36, %v768_v37  ;;  %v895_v39 = vpop.f32.mrb[7].mxu1 }
 0x900   :  { %772 = vst [vmem:[%s1383_s14] sm:$0xff] %v769_v38 }
 0x901   :  { %781 = vsyncpa [#allocation3], 1 }
 0x902   :  { %782 = vsyncpa [#allocation5], 1 }
 0x903   :  { %783 = vsyncpa [#allocation8], 1 }

</bundles_post_ra>
